<compile_context>
chip_gen: v5e
topology: v5e:2x2
jax: 0.10.0
libtpu: 0.0.40
codegen_flags: <defaults>
</compile_context>

<pallas_src>
import jax
import jax.numpy as jnp
from jax.experimental import pallas as pl
from jax.experimental.pallas import tpu as pltpu


_TILE_BUDGET_BYTES = 2 << 20     # per data tile (sized on the wider of x/out dtypes)
_TR_CAP = 1024                   # caps the lane-padded (tr,128) weight buffer at 512 KiB (f32)
_VMEM_LIMIT_BYTES = 32 << 20     # residency is ~<=10 MiB double-buffered; 32 MiB safe on v5e/v6e/v7x
_SMALL_INPUT_ELEMS = 1 << 16     # below this a fused XLA multiply beats per-call overhead
_MIN_BYTES_FOR_SPLIT = 1 << 20   # above this aim for >= 4 grid programs


def _round_up(x: int, m: int) -> int:
    return (x + m - 1) // m * m


def _round_down(x: int, m: int) -> int:
    return (x // m) * m


def _cdiv(a: int, b: int) -> int:
    return -(-a // b)


def _sublane_multiple(dtype) -> int:
    itemsize = jnp.dtype(dtype).itemsize
    if itemsize == 1:
        return 32
    if itemsize == 2:
        return 16
    return 8


def _apply_vector_weights_kernel(x_ref, w_ref, o_ref):
    # x_ref: (tr, tc) tile of the feature map in its NATIVE dtype.
    # w_ref: (tr, 1)  per-(batch*channel) weights (already promoted dtype),
    #        lane-broadcast on the VPU.
    # The in-kernel cast is free: 1 of 4 VALU slots used, kernel is HBM/DMA bound.
    o_ref[...] = x_ref[...].astype(o_ref.dtype) * w_ref[...]


def _choose_tiles(rows: int, cols: int, x_itemsize: int, out_itemsize: int, sub: int):
    """Pick (tr, tc): lane-long tiles, ~_TILE_BUDGET_BYTES per data tile, tr capped."""
    tile_elems = max(_TILE_BUDGET_BYTES // max(x_itemsize, out_itemsize), sub * 128)

    # Columns: as lane-long as the budget allows (contiguous per-row DMA, unmasked
    # vst), never wider than the array (partial last block is fine).
    if cols <= 128:
        tc = cols                                    # equal-to-full-dim block
    else:
        tc_budget = max(128, _round_down(tile_elems // sub, 128))
        tc = min(tc_budget, max(128, _round_down(cols, 128)))

    # Rows: fill the remaining budget, multiple of the sublane tile, capped so the
    # lane-padded (tr, 128) weight block stays small in the VMEM budget.
    if rows <= sub:
        tr = rows                                    # equal-to-full-dim block
    else:
        tr = max(sub, _round_down(tile_elems // tc, sub))
        tr = min(tr, _TR_CAP, max(sub, _round_down(rows, sub)))

    # For inputs worth pipelining, ensure >= 4 grid programs (prefer an even row
    # split so both v7x TensorCores are fed; keeps tc lane-long per v5e/v6e advice).
    total_bytes = rows * cols * (x_itemsize + out_itemsize)
    if total_bytes >= _MIN_BYTES_FOR_SPLIT:
        for _ in range(8):
            if _cdiv(rows, tr) * _cdiv(cols, tc) >= 4:
                break
            if rows > sub and tr > sub:              # split rows first
                tr = max(sub, _round_up(tr // 2, sub))
            elif cols > 128 and tc > 128:
                tc = max(128, _round_up(tc // 2, 128))
            else:
                break
    return tr, tc


def apply_vector_weights(x: jnp.ndarray, weights: jnp.ndarray, *, force_pallas: bool = False):
    """x: (N, C, H, W), weights: (N, C, 1, 1) -> x * weights (PyTorch broadcast semantics)."""
    N, C, H, W = x.shape
    assert weights.shape == (N, C, 1, 1), "expected per-(batch,channel) vector weights"

    # Match torch type promotion (e.g. bf16 * f32 -> f32). Output is the promoted dtype.
    compute_dtype = jnp.promote_types(x.dtype, weights.dtype)

    # Small-input fast path: per-call / per-step overhead dominates at KB scale.
    if (not force_pallas) and x.size < _SMALL_INPUT_ELEMS:
        return x.astype(compute_dtype) * weights.astype(compute_dtype)

    rows, cols = N * C, H * W
    x2 = x.reshape(rows, cols)                            # native dtype; no extra HBM pass
    w2 = weights.reshape(rows, 1).astype(compute_dtype)   # tiny; cast here is free

    x_itemsize = jnp.dtype(x.dtype).itemsize
    out_itemsize = jnp.dtype(compute_dtype).itemsize
    sub = max(_sublane_multiple(x.dtype), _sublane_multiple(compute_dtype))

    tr, tc = _choose_tiles(rows, cols, x_itemsize, out_itemsize, sub)
    # Column axis last => fastest varying => weight block index (i, 0) constant
    # across consecutive steps, so the (tr, 1) weight tile is fetched once per row-block.
    grid = (_cdiv(rows, tr), _cdiv(cols, tc))

    out2 = pl.pallas_call(
        _apply_vector_weights_kernel,
        out_shape=jax.ShapeDtypeStruct((rows, cols), compute_dtype),
        grid_spec=pltpu.PrefetchScalarGridSpec(
            num_scalar_prefetch=0,
            grid=grid,
            in_specs=[
                pl.BlockSpec((tr, tc), lambda i, j: (i, j)),
                pl.BlockSpec((tr, 1), lambda i, j: (i, 0)),   # reused across the column axis
            ],
            out_specs=pl.BlockSpec((tr, tc), lambda i, j: (i, j)),
        ),
        compiler_params=pltpu.CompilerParams(
            dimension_semantics=("parallel", "parallel"),
            vmem_limit_bytes=_VMEM_LIMIT_BYTES,
        ),
    )(x2, w2)

    return out2.reshape(N, C, H, W)


if __name__ == "__main__":
    key = jax.random.PRNGKey(0)
    kx, kw, kx2, kw2, kx3, kw3 = jax.random.split(key, 6)

    # 1) Aligned shapes consistent with the module's intended use.
    N, C, H, W = 2, 4, 16, 16
    x = jax.random.normal(kx, (N, C, H, W), dtype=jnp.float32)
    weights = jax.random.normal(kw, (N, C, 1, 1), dtype=jnp.float32)
    out = jax.block_until_ready(apply_vector_weights(x, weights, force_pallas=True))
    ref = x * weights
    assert out.shape == ref.shape and out.dtype == ref.dtype
    assert jnp.allclose(out, ref, atol=1e-6, rtol=1e-6)

    # 2) Non-aligned rows/cols: regression check for masked partial edge tiles
    #    (no wrapper pad/slice anymore).
    N2, C2, H2, W2 = 2, 3, 13, 13
    xb = jax.random.normal(kx2, (N2, C2, H2, W2), dtype=jnp.float32)
    wb = jax.random.normal(kw2, (N2, C2, 1, 1), dtype=jnp.float32)
    out2 = jax.block_until_ready(apply_vector_weights(xb, wb, force_pallas=True))
    assert jnp.allclose(out2, xb * wb, atol=1e-6, rtol=1e-6)

    # 3) Mixed dtype (bf16 activations, f32 weights): exercises the in-kernel cast;
    #    output dtype is the promoted dtype (f32), matching torch promotion.
    xc = jax.random.normal(kx3, (N, C, H, W), dtype=jnp.bfloat16)
    wc = jax.random.normal(kw3, (N, C, 1, 1), dtype=jnp.float32)
    out3 = jax.block_until_ready(apply_vector_weights(xc, wc, force_pallas=True))
    ref3 = xc.astype(jnp.float32) * wc
    assert out3.dtype == jnp.float32
    assert jnp.allclose(out3, ref3, atol=1e-6, rtol=1e-6)

    print("KERNEL_OK")
</pallas_src>

<mosaic_0001>
module attributes {stable_mosaic.version = 11 : i64} {
  func.func @_apply_vector_weights_kernel(%arg0: i32, %arg1: i32, %arg2: memref<8x256xf32, #tpu.memory_space<vmem>>, %arg3: memref<8x1xf32, #tpu.memory_space<vmem>>, %arg4: memref<8x256xf32, #tpu.memory_space<vmem>>) attributes {dimension_semantics = [#tpu.dimension_semantics<parallel>, #tpu.dimension_semantics<parallel>], iteration_bounds = array<i64: 1, 1>, scalar_prefetch = 0 : i64, scratch_operands = 0 : i64, tpu.core_type = #tpu.core_type<tc>, window_params = [{transform_indices = @transform_0, window_bounds = array<i64: 8, 256>}, {transform_indices = @transform_1, window_bounds = array<i64: 8, 1>}, {transform_indices = @transform_2, window_bounds = array<i64: 8, 256>}]} {
    %c0 = arith.constant 0 : index
    %c0_0 = arith.constant 0 : index
    %0 = vector.load %arg2[%c0, %c0_0] : memref<8x256xf32, #tpu.memory_space<vmem>>, vector<8x256xf32>
    %c0_1 = arith.constant 0 : index
    %c0_2 = arith.constant 0 : index
    %1 = vector.load %arg3[%c0_1, %c0_2] : memref<8x1xf32, #tpu.memory_space<vmem>>, vector<8x1xf32>
    %2 = vector.broadcast %1 : vector<8x1xf32> to vector<8x256xf32>
    %3 = arith.mulf %0, %2 : vector<8x256xf32>
    %c0_3 = arith.constant 0 : index
    %c0_4 = arith.constant 0 : index
    %4 = vector.load %arg4[%c0_3, %c0_4] : memref<8x256xf32, #tpu.memory_space<vmem>>, vector<8x256xf32>
    tpu.vector_store %arg4[%c0_3, %c0_4], %3 {strides = array<i32>} : memref<8x256xf32, #tpu.memory_space<vmem>>, vector<8x256xf32>,
    return
  }
  func.func @transform_0(%arg0: i32, %arg1: i32) -> (i32, i32) {
    %c0_i32 = arith.constant 0 : i32
    return %arg0, %arg1 : i32, i32
  }
  func.func @transform_1(%arg0: i32, %arg1: i32) -> (i32, i32) {
    %c0_i32 = arith.constant 0 : i32
    %c0_i32_0 = arith.constant 0 : i32
    return %arg0, %c0_i32 : i32, i32
  }
  func.func @transform_2(%arg0: i32, %arg1: i32) -> (i32, i32) {
    %c0_i32 = arith.constant 0 : i32
    return %arg0, %arg1 : i32, i32
  }
}

</mosaic_0001>

<bundles_post_ra>
// kernel: tpu_custom_call.1
= control target key start
LH: loop header
LB: loop body
LE: loop exit
PB: predicated region body
PF: predicated region fallthrough
CT: control target
= control target key end

     0   :  { %7 = vsyncpa [#allocation3], 0  ;;  %s138_s0 = inlined_call_operand.hbm [shape: f32[8,256], index: 0, kind: input, shape index: {}]   ;;  %s139_s1 = inlined_call_operand.vmem [shape: f32[8,1], index: 1, kind: input, shape index: {}]   ;;  %s140_s2 = inlined_call_operand.hbm [shape: f32[8,256], index: 2, kind: output, shape index: {}]  }
   0x1   :  { %8 = vsyncpa [#allocation4], 0  ;;  %s14_s11 = sshll.u32 %s138_s0, 4  ;;  %s111_s12 = smov [#allocation2]   ;;  %s15_s11 = int_to_ptr.hbm [resolvable:$true] %s14_s11 }
   0x2   :  { %s16_s13 = sshll.u32 %s111_s12, 4  ;;  %s17_s13 = int_to_ptr.vmem [resolvable:$true] %s16_s13 }
   0x3   :  { %19 = dma.hbm_to_vmem [thread:$0]  %s15_s11, 256, %s17_s13, [#allocation3]  }
   0x4   :  { %107 = dma.done.wait [#allocation3], 256  }
   0x5   :  { %108 = vsyncadd [#allocation3], 4294967040  ;;  %v112_v0 = vmov 0   ;;  %v28_v1 = vld [vmem:[%s139_s1] sm:$0xff]  ;;  %v27_v3 = vld [vmem:[#allocation2 + $0x8] sm:$0xff]  ;;  %s113_s16 = smov [#allocation5]  }
   0x6   :  { %58 = vset.pattern.permute.xlu0 %v112_v0  ;;  %v26_v2 = vld [vmem:[#allocation2] sm:$0xff]  ;;  %s43_s17 = sshll.u32 %s113_s16, 4  ;;  %s45_s19 = sshll.u32 %s140_s2, 4  ;;  %s44_s17 = int_to_ptr.vmem [resolvable:$true] %s43_s17  ;;  %s46_s19 = int_to_ptr.hbm [resolvable:$true] %s45_s19 }
   0x7   :  { %31 = vperm.xlu0 %58, %v28_v1  }
  0x79   :  { %v32_v4 = vpop.permute.xlu0 %31 }
  0x7a   :  { %v34_v5 = vmul.f32 %v32_v4, %v26_v2  ;;  %v35_v6 = vmul.f32 %v32_v4, %v27_v3 }
  0x7c   :  { %36 = vst [vmem:[#allocation5] sm:$0xff] %v34_v5 }
  0x7d   :  { %37 = vst [vmem:[#allocation5 + $0x8] sm:$0xff] %v35_v6 }
  0x7e   :  { %48 = dma.vmem_to_hbm [thread:$0]  %s44_s17, 256, %s46_s19, [#allocation4]  }
  0x7f   :  { %109 = dma.done.wait [#allocation4], 256  }
  0x80   :  { %110 = vsyncadd [#allocation4], 4294967040 }
  0x81   :  { %53 = vsyncpa [#allocation3], 1 }
  0x82   :  { %54 = vsyncpa [#allocation4], 1 }

</bundles_post_ra>
